<compile_context>
chip_gen: v7x
topology: tpu7x:2x2x1
jax: 0.10.0
libtpu: 0.0.40
codegen_flags: <defaults>
</compile_context>

<pallas_src>
import functools

import jax
import jax.numpy as jnp
from jax import lax
from jax.experimental import pallas as pl
from jax.experimental.pallas import tpu as pltpu

BATCH_TILE = 8  # batch rows per grid step (one sublane tile of the output)


def weighted_bow_kernel(idx_ref, len_ref, emb_ref, w_ref, out_ref, *,
                        batch_tile, hp):
    """One grid step = one tile of `batch_tile` sentences, full position reduction.

    idx_ref : SMEM (Bp, T) int32      word indices (scalar prefetch)
    len_ref : SMEM (Bp,)   int32      sentence lengths (scalar prefetch)
    emb_ref : VMEM (V, 1, Hp)         whole embedding table (resident, DMA'd once)
    w_ref   : VMEM (T, 1, Hp)         whole position-weight table (resident)
    out_ref : VMEM (batch_tile, Hp)   output tile for this batch tile (f32)
    """
    tile = pl.program_id(0)

    rows = []
    for b_local in range(batch_tile):  # static unroll over the batch tile
        b = tile * batch_tile + b_local
        n = len_ref[b]                 # inner loop bounded by sentence length:
                                       # padded positions issue no load / FMA.

        def body(t, acc, b=b):
            tok = idx_ref[b, t]                           # SMEM scalar read
            row = emb_ref[tok].astype(jnp.float32)        # (1, Hp) VMEM gather
            w = w_ref[t].astype(jnp.float32)              # (1, Hp)
            return acc + row * w

        acc = lax.fori_loop(0, n, body, jnp.zeros((1, hp), jnp.float32))
        rows.append(acc)

    # Single lane/sublane-dense (batch_tile, Hp) writeback.
    out_ref[...] = jnp.concatenate(rows, axis=0).astype(out_ref.dtype)


def sentence_encoder_forward(indices, lengths, emb_table, pos_weights,
                             *, batch_tile=BATCH_TILE):
    """SentenceEncoder.forward(input, lengths) -> sentence embeddings (B, H)."""
    B, T = indices.shape
    V, H = emb_table.shape
    pos_weights = pos_weights[:T]

    # Lane-dense hidden dimension (multiple of 128); pad params, slice output back.
    Hp = max(128, ((H + 127) // 128) * 128)
    if Hp != H:
        emb_table = jnp.pad(emb_table, ((0, 0), (0, Hp - H)))
        pos_weights = jnp.pad(pos_weights, ((0, 0), (0, Hp - H)))

    # Pad batch to a multiple of the batch tile; padded rows get length 0
    # (zero-trip inner loop, zero output row) and are sliced off below.
    Bp = ((B + batch_tile - 1) // batch_tile) * batch_tile
    indices = indices.astype(jnp.int32)
    lengths = lengths.reshape(B).astype(jnp.int32)
    if Bp != B:
        indices = jnp.pad(indices, ((0, Bp - B), (0, 0)))
        lengths = jnp.pad(lengths, ((0, Bp - B),))

    # 3-D so every block's last two dims equal the full array dims
    # (leading gather axis is untiled -> no (8,128) constraint on it).
    emb3 = emb_table.reshape(V, 1, Hp)
    w3 = pos_weights.reshape(T, 1, Hp)

    itemsize = jnp.dtype(emb_table.dtype).itemsize
    table_bytes = (V + T) * Hp * itemsize
    # Explicit VMEM budget: resident tables + output tiles + headroom, capped for
    # v7x's 64 MiB physical VMEM (v5e/v6e have 128 MiB, so this is safe everywhere).
    vmem_limit = int(min(64 << 20,
                         max(32 << 20, 2 * table_bytes + (4 << 20))))

    kernel = functools.partial(weighted_bow_kernel,
                               batch_tile=batch_tile, hp=Hp)

    grid_spec = pltpu.PrefetchScalarGridSpec(
        num_scalar_prefetch=2,            # indices, lengths -> SMEM
        grid=(Bp // batch_tile,),         # batch tiles only; T reduced in-kernel
        in_specs=[
            # Whole embedding table, constant block index -> DMA'd once, resident.
            pl.BlockSpec((V, 1, Hp), lambda i, idx, lens: (0, 0, 0)),
            # Whole position-weight table, resident in VMEM.
            pl.BlockSpec((T, 1, Hp), lambda i, idx, lens: (0, 0, 0)),
        ],
        out_specs=pl.BlockSpec((batch_tile, Hp), lambda i, idx, lens: (i, 0)),
    )

    cost = pl.CostEstimate(
        flops=2 * B * T * Hp,
        transcendentals=0,
        bytes_accessed=(V * Hp * itemsize       # embedding table, once
                        + T * Hp * itemsize      # position weights, once
                        + Bp * T * 4 + Bp * 4    # indices + lengths
                        + Bp * Hp * 4),          # output
    )

    out = pl.pallas_call(
        kernel,
        out_shape=jax.ShapeDtypeStruct((Bp, Hp), jnp.float32),
        grid_spec=grid_spec,
        compiler_params=pltpu.CompilerParams(
            dimension_semantics=("parallel",),   # batch tiles across TCs (v7x)
            vmem_limit_bytes=vmem_limit),
        cost_estimate=cost,
    )(indices, lengths, emb3, w3)

    return out[:B, :H]


def reference_forward(indices, lengths, emb_table, pos_weights):
    """Pure-JAX reference for correctness checking."""
    emb = jnp.take(emb_table, indices, axis=0)                      # (B, T, H)
    T = indices.shape[1]
    pos = jnp.arange(T)[None, :]
    mask = (pos < lengths[:, None]).astype(jnp.float32)             # (B, T)
    weighted = emb * pos_weights[None, :T, :] * mask[:, :, None]
    return weighted.sum(axis=1)


if __name__ == "__main__":
    # Small synthetic config consistent with the module:
    #   opt.vSize -> V (vocab), opt.hSize -> H (hidden), max_words -> T
    B, T, V, H = 2, 8, 32, 32

    key = jax.random.PRNGKey(0)
    k_emb, k_w, k_idx = jax.random.split(key, 3)

    emb_table = jax.random.normal(k_emb, (V, H), dtype=jnp.float32) * 0.1
    pos_weights = jnp.ones((T, H), dtype=jnp.float32) \
        + 0.01 * jax.random.normal(k_w, (T, H), dtype=jnp.float32)

    # Example inputs: word indices (pad index = 0 beyond sentence length).
    lengths = jnp.array([8, 5], dtype=jnp.int32)                    # (B,)
    indices = jax.random.randint(k_idx, (B, T), 1, V, dtype=jnp.int32)
    pad_mask = jnp.arange(T)[None, :] < lengths[:, None]
    indices = jnp.where(pad_mask, indices, 0)

    out = sentence_encoder_forward(indices, lengths, emb_table, pos_weights)
    out = jax.block_until_ready(out)

    ref = reference_forward(indices, lengths, emb_table, pos_weights)
    assert out.shape == (B, H)
    assert jnp.allclose(out, ref, atol=1e-5, rtol=1e-5), "mismatch vs reference"

    print("KERNEL_OK")
</pallas_src>

<mosaic_0001>
module attributes {stable_mosaic.version = 11 : i64} {
  func.func @weighted_bow_kernel(%arg0: i32, %arg1: memref<8x8xi32, #tpu.memory_space<smem>>, %arg2: memref<8xi32, #tpu.memory_space<smem>>, %arg3: memref<32x1x128xf32, #tpu.memory_space<vmem>>, %arg4: memref<8x1x128xf32, #tpu.memory_space<vmem>>, %arg5: memref<8x128xf32, #tpu.memory_space<vmem>>) attributes {dimension_semantics = [#tpu.dimension_semantics<parallel>], iteration_bounds = array<i64: 1>, scalar_prefetch = 2 : i64, scratch_operands = 0 : i64, tpu.core_type = #tpu.core_type<tc>, window_params = [{pipeline_mode = #tpu.pipeline_mode<synchronous>, transform_indices = @transform_0, window_bounds = array<i64: 32, 1, 128>}, {pipeline_mode = #tpu.pipeline_mode<synchronous>, transform_indices = @transform_1, window_bounds = array<i64: 8, 1, 128>}, {transform_indices = @transform_2, window_bounds = array<i64: 8, 128>}]} {
    %c8_i32 = arith.constant 8 : i32
    %0 = arith.muli %arg0, %c8_i32 : i32
    %c0_i32 = arith.constant 0 : i32
    %1 = arith.addi %0, %c0_i32 : i32
    %2 = arith.index_cast %1 : i32 to index
    %3 = memref.load %arg2[%2] : memref<8xi32, #tpu.memory_space<smem>>
    %cst = arith.constant 0.000000e+00 : f32
    %4 = vector.broadcast %cst : f32 to vector<1x128xf32>
    %c0_i32_0 = arith.constant 0 : i32
    %5 = arith.subi %3, %c0_i32_0 : i32
    %6 = arith.addi %c0_i32_0, %5 : i32
    %c1_i32 = arith.constant 1 : i32
    %7 = scf.for %arg6 = %c0_i32_0 to %6 step %c1_i32 iter_args(%arg7 = %4) -> (vector<1x128xf32>)  : i32 {
      %66 = arith.index_cast %1 : i32 to index
      %67 = arith.index_cast %arg6 : i32 to index
      %68 = memref.load %arg1[%66, %67] : memref<8x8xi32, #tpu.memory_space<smem>>
      %69 = arith.index_cast %68 : i32 to index
      %c0_31 = arith.constant 0 : index
      %c0_32 = arith.constant 0 : index
      %70 = vector.load %arg3[%69, %c0_31, %c0_32] : memref<32x1x128xf32, #tpu.memory_space<vmem>>, vector<1x1x128xf32>
      %71 = vector.shape_cast %70 : vector<1x1x128xf32> to vector<1x128xf32>
      %72 = arith.index_cast %arg6 : i32 to index
      %c0_33 = arith.constant 0 : index
      %c0_34 = arith.constant 0 : index
      %73 = vector.load %arg4[%72, %c0_33, %c0_34] : memref<8x1x128xf32, #tpu.memory_space<vmem>>, vector<1x1x128xf32>
      %74 = vector.shape_cast %73 : vector<1x1x128xf32> to vector<1x128xf32>
      %75 = arith.mulf %71, %74 : vector<1x128xf32>
      %76 = arith.addf %arg7, %75 : vector<1x128xf32>
      scf.yield %76 : vector<1x128xf32>
    }
    %c8_i32_1 = arith.constant 8 : i32
    %8 = arith.muli %arg0, %c8_i32_1 : i32
    %c1_i32_2 = arith.constant 1 : i32
    %9 = arith.addi %8, %c1_i32_2 : i32
    %10 = arith.index_cast %9 : i32 to index
    %11 = memref.load %arg2[%10] : memref<8xi32, #tpu.memory_space<smem>>
    %cst_3 = arith.constant 0.000000e+00 : f32
    %12 = vector.broadcast %cst_3 : f32 to vector<1x128xf32>
    %c0_i32_4 = arith.constant 0 : i32
    %13 = arith.subi %11, %c0_i32_4 : i32
    %14 = arith.addi %c0_i32_4, %13 : i32
    %c1_i32_5 = arith.constant 1 : i32
    %15 = scf.for %arg6 = %c0_i32_4 to %14 step %c1_i32_5 iter_args(%arg7 = %12) -> (vector<1x128xf32>)  : i32 {
      %66 = arith.index_cast %9 : i32 to index
      %67 = arith.index_cast %arg6 : i32 to index
      %68 = memref.load %arg1[%66, %67] : memref<8x8xi32, #tpu.memory_space<smem>>
      %69 = arith.index_cast %68 : i32 to index
      %c0_31 = arith.constant 0 : index
      %c0_32 = arith.constant 0 : index
      %70 = vector.load %arg3[%69, %c0_31, %c0_32] : memref<32x1x128xf32, #tpu.memory_space<vmem>>, vector<1x1x128xf32>
      %71 = vector.shape_cast %70 : vector<1x1x128xf32> to vector<1x128xf32>
      %72 = arith.index_cast %arg6 : i32 to index
      %c0_33 = arith.constant 0 : index
      %c0_34 = arith.constant 0 : index
      %73 = vector.load %arg4[%72, %c0_33, %c0_34] : memref<8x1x128xf32, #tpu.memory_space<vmem>>, vector<1x1x128xf32>
      %74 = vector.shape_cast %73 : vector<1x1x128xf32> to vector<1x128xf32>
      %75 = arith.mulf %71, %74 : vector<1x128xf32>
      %76 = arith.addf %arg7, %75 : vector<1x128xf32>
      scf.yield %76 : vector<1x128xf32>
    }
    %c8_i32_6 = arith.constant 8 : i32
    %16 = arith.muli %arg0, %c8_i32_6 : i32
    %c2_i32 = arith.constant 2 : i32
    %17 = arith.addi %16, %c2_i32 : i32
    %18 = arith.index_cast %17 : i32 to index
    %19 = memref.load %arg2[%18] : memref<8xi32, #tpu.memory_space<smem>>
    %cst_7 = arith.constant 0.000000e+00 : f32
    %20 = vector.broadcast %cst_7 : f32 to vector<1x128xf32>
    %c0_i32_8 = arith.constant 0 : i32
    %21 = arith.subi %19, %c0_i32_8 : i32
    %22 = arith.addi %c0_i32_8, %21 : i32
    %c1_i32_9 = arith.constant 1 : i32
    %23 = scf.for %arg6 = %c0_i32_8 to %22 step %c1_i32_9 iter_args(%arg7 = %20) -> (vector<1x128xf32>)  : i32 {
      %66 = arith.index_cast %17 : i32 to index
      %67 = arith.index_cast %arg6 : i32 to index
      %68 = memref.load %arg1[%66, %67] : memref<8x8xi32, #tpu.memory_space<smem>>
      %69 = arith.index_cast %68 : i32 to index
      %c0_31 = arith.constant 0 : index
      %c0_32 = arith.constant 0 : index
      %70 = vector.load %arg3[%69, %c0_31, %c0_32] : memref<32x1x128xf32, #tpu.memory_space<vmem>>, vector<1x1x128xf32>
      %71 = vector.shape_cast %70 : vector<1x1x128xf32> to vector<1x128xf32>
      %72 = arith.index_cast %arg6 : i32 to index
      %c0_33 = arith.constant 0 : index
      %c0_34 = arith.constant 0 : index
      %73 = vector.load %arg4[%72, %c0_33, %c0_34] : memref<8x1x128xf32, #tpu.memory_space<vmem>>, vector<1x1x128xf32>
      %74 = vector.shape_cast %73 : vector<1x1x128xf32> to vector<1x128xf32>
      %75 = arith.mulf %71, %74 : vector<1x128xf32>
      %76 = arith.addf %arg7, %75 : vector<1x128xf32>
      scf.yield %76 : vector<1x128xf32>
    }
    %c8_i32_10 = arith.constant 8 : i32
    %24 = arith.muli %arg0, %c8_i32_10 : i32
    %c3_i32 = arith.constant 3 : i32
    %25 = arith.addi %24, %c3_i32 : i32
    %26 = arith.index_cast %25 : i32 to index
    %27 = memref.load %arg2[%26] : memref<8xi32, #tpu.memory_space<smem>>
    %cst_11 = arith.constant 0.000000e+00 : f32
    %28 = vector.broadcast %cst_11 : f32 to vector<1x128xf32>
    %c0_i32_12 = arith.constant 0 : i32
    %29 = arith.subi %27, %c0_i32_12 : i32
    %30 = arith.addi %c0_i32_12, %29 : i32
    %c1_i32_13 = arith.constant 1 : i32
    %31 = scf.for %arg6 = %c0_i32_12 to %30 step %c1_i32_13 iter_args(%arg7 = %28) -> (vector<1x128xf32>)  : i32 {
      %66 = arith.index_cast %25 : i32 to index
      %67 = arith.index_cast %arg6 : i32 to index
      %68 = memref.load %arg1[%66, %67] : memref<8x8xi32, #tpu.memory_space<smem>>
      %69 = arith.index_cast %68 : i32 to index
      %c0_31 = arith.constant 0 : index
      %c0_32 = arith.constant 0 : index
      %70 = vector.load %arg3[%69, %c0_31, %c0_32] : memref<32x1x128xf32, #tpu.memory_space<vmem>>, vector<1x1x128xf32>
      %71 = vector.shape_cast %70 : vector<1x1x128xf32> to vector<1x128xf32>
      %72 = arith.index_cast %arg6 : i32 to index
      %c0_33 = arith.constant 0 : index
      %c0_34 = arith.constant 0 : index
      %73 = vector.load %arg4[%72, %c0_33, %c0_34] : memref<8x1x128xf32, #tpu.memory_space<vmem>>, vector<1x1x128xf32>
      %74 = vector.shape_cast %73 : vector<1x1x128xf32> to vector<1x128xf32>
      %75 = arith.mulf %71, %74 : vector<1x128xf32>
      %76 = arith.addf %arg7, %75 : vector<1x128xf32>
      scf.yield %76 : vector<1x128xf32>
    }
    %c8_i32_14 = arith.constant 8 : i32
    %32 = arith.muli %arg0, %c8_i32_14 : i32
    %c4_i32 = arith.constant 4 : i32
    %33 = arith.addi %32, %c4_i32 : i32
    %34 = arith.index_cast %33 : i32 to index
    %35 = memref.load %arg2[%34] : memref<8xi32, #tpu.memory_space<smem>>
    %cst_15 = arith.constant 0.000000e+00 : f32
    %36 = vector.broadcast %cst_15 : f32 to vector<1x128xf32>
    %c0_i32_16 = arith.constant 0 : i32
    %37 = arith.subi %35, %c0_i32_16 : i32
    %38 = arith.addi %c0_i32_16, %37 : i32
    %c1_i32_17 = arith.constant 1 : i32
    %39 = scf.for %arg6 = %c0_i32_16 to %38 step %c1_i32_17 iter_args(%arg7 = %36) -> (vector<1x128xf32>)  : i32 {
      %66 = arith.index_cast %33 : i32 to index
      %67 = arith.index_cast %arg6 : i32 to index
      %68 = memref.load %arg1[%66, %67] : memref<8x8xi32, #tpu.memory_space<smem>>
      %69 = arith.index_cast %68 : i32 to index
      %c0_31 = arith.constant 0 : index
      %c0_32 = arith.constant 0 : index
      %70 = vector.load %arg3[%69, %c0_31, %c0_32] : memref<32x1x128xf32, #tpu.memory_space<vmem>>, vector<1x1x128xf32>
      %71 = vector.shape_cast %70 : vector<1x1x128xf32> to vector<1x128xf32>
      %72 = arith.index_cast %arg6 : i32 to index
      %c0_33 = arith.constant 0 : index
      %c0_34 = arith.constant 0 : index
      %73 = vector.load %arg4[%72, %c0_33, %c0_34] : memref<8x1x128xf32, #tpu.memory_space<vmem>>, vector<1x1x128xf32>
      %74 = vector.shape_cast %73 : vector<1x1x128xf32> to vector<1x128xf32>
      %75 = arith.mulf %71, %74 : vector<1x128xf32>
      %76 = arith.addf %arg7, %75 : vector<1x128xf32>
      scf.yield %76 : vector<1x128xf32>
    }
    %c8_i32_18 = arith.constant 8 : i32
    %40 = arith.muli %arg0, %c8_i32_18 : i32
    %c5_i32 = arith.constant 5 : i32
    %41 = arith.addi %40, %c5_i32 : i32
    %42 = arith.index_cast %41 : i32 to index
    %43 = memref.load %arg2[%42] : memref<8xi32, #tpu.memory_space<smem>>
    %cst_19 = arith.constant 0.000000e+00 : f32
    %44 = vector.broadcast %cst_19 : f32 to vector<1x128xf32>
    %c0_i32_20 = arith.constant 0 : i32
    %45 = arith.subi %43, %c0_i32_20 : i32
    %46 = arith.addi %c0_i32_20, %45 : i32
    %c1_i32_21 = arith.constant 1 : i32
    %47 = scf.for %arg6 = %c0_i32_20 to %46 step %c1_i32_21 iter_args(%arg7 = %44) -> (vector<1x128xf32>)  : i32 {
      %66 = arith.index_cast %41 : i32 to index
      %67 = arith.index_cast %arg6 : i32 to index
      %68 = memref.load %arg1[%66, %67] : memref<8x8xi32, #tpu.memory_space<smem>>
      %69 = arith.index_cast %68 : i32 to index
      %c0_31 = arith.constant 0 : index
      %c0_32 = arith.constant 0 : index
      %70 = vector.load %arg3[%69, %c0_31, %c0_32] : memref<32x1x128xf32, #tpu.memory_space<vmem>>, vector<1x1x128xf32>
      %71 = vector.shape_cast %70 : vector<1x1x128xf32> to vector<1x128xf32>
      %72 = arith.index_cast %arg6 : i32 to index
      %c0_33 = arith.constant 0 : index
      %c0_34 = arith.constant 0 : index
      %73 = vector.load %arg4[%72, %c0_33, %c0_34] : memref<8x1x128xf32, #tpu.memory_space<vmem>>, vector<1x1x128xf32>
      %74 = vector.shape_cast %73 : vector<1x1x128xf32> to vector<1x128xf32>
      %75 = arith.mulf %71, %74 : vector<1x128xf32>
      %76 = arith.addf %arg7, %75 : vector<1x128xf32>
      scf.yield %76 : vector<1x128xf32>
    }
    %c8_i32_22 = arith.constant 8 : i32
    %48 = arith.muli %arg0, %c8_i32_22 : i32
    %c6_i32 = arith.constant 6 : i32
    %49 = arith.addi %48, %c6_i32 : i32
    %50 = arith.index_cast %49 : i32 to index
    %51 = memref.load %arg2[%50] : memref<8xi32, #tpu.memory_space<smem>>
    %cst_23 = arith.constant 0.000000e+00 : f32
    %52 = vector.broadcast %cst_23 : f32 to vector<1x128xf32>
    %c0_i32_24 = arith.constant 0 : i32
    %53 = arith.subi %51, %c0_i32_24 : i32
    %54 = arith.addi %c0_i32_24, %53 : i32
    %c1_i32_25 = arith.constant 1 : i32
    %55 = scf.for %arg6 = %c0_i32_24 to %54 step %c1_i32_25 iter_args(%arg7 = %52) -> (vector<1x128xf32>)  : i32 {
      %66 = arith.index_cast %49 : i32 to index
      %67 = arith.index_cast %arg6 : i32 to index
      %68 = memref.load %arg1[%66, %67] : memref<8x8xi32, #tpu.memory_space<smem>>
      %69 = arith.index_cast %68 : i32 to index
      %c0_31 = arith.constant 0 : index
      %c0_32 = arith.constant 0 : index
      %70 = vector.load %arg3[%69, %c0_31, %c0_32] : memref<32x1x128xf32, #tpu.memory_space<vmem>>, vector<1x1x128xf32>
      %71 = vector.shape_cast %70 : vector<1x1x128xf32> to vector<1x128xf32>
      %72 = arith.index_cast %arg6 : i32 to index
      %c0_33 = arith.constant 0 : index
      %c0_34 = arith.constant 0 : index
      %73 = vector.load %arg4[%72, %c0_33, %c0_34] : memref<8x1x128xf32, #tpu.memory_space<vmem>>, vector<1x1x128xf32>
      %74 = vector.shape_cast %73 : vector<1x1x128xf32> to vector<1x128xf32>
      %75 = arith.mulf %71, %74 : vector<1x128xf32>
      %76 = arith.addf %arg7, %75 : vector<1x128xf32>
      scf.yield %76 : vector<1x128xf32>
    }
    %c8_i32_26 = arith.constant 8 : i32
    %56 = arith.muli %arg0, %c8_i32_26 : i32
    %c7_i32 = arith.constant 7 : i32
    %57 = arith.addi %56, %c7_i32 : i32
    %58 = arith.index_cast %57 : i32 to index
    %59 = memref.load %arg2[%58] : memref<8xi32, #tpu.memory_space<smem>>
    %cst_27 = arith.constant 0.000000e+00 : f32
    %60 = vector.broadcast %cst_27 : f32 to vector<1x128xf32>
    %c0_i32_28 = arith.constant 0 : i32
    %61 = arith.subi %59, %c0_i32_28 : i32
    %62 = arith.addi %c0_i32_28, %61 : i32
    %c1_i32_29 = arith.constant 1 : i32
    %63 = scf.for %arg6 = %c0_i32_28 to %62 step %c1_i32_29 iter_args(%arg7 = %60) -> (vector<1x128xf32>)  : i32 {
      %66 = arith.index_cast %57 : i32 to index
      %67 = arith.index_cast %arg6 : i32 to index
      %68 = memref.load %arg1[%66, %67] : memref<8x8xi32, #tpu.memory_space<smem>>
      %69 = arith.index_cast %68 : i32 to index
      %c0_31 = arith.constant 0 : index
      %c0_32 = arith.constant 0 : index
      %70 = vector.load %arg3[%69, %c0_31, %c0_32] : memref<32x1x128xf32, #tpu.memory_space<vmem>>, vector<1x1x128xf32>
      %71 = vector.shape_cast %70 : vector<1x1x128xf32> to vector<1x128xf32>
      %72 = arith.index_cast %arg6 : i32 to index
      %c0_33 = arith.constant 0 : index
      %c0_34 = arith.constant 0 : index
      %73 = vector.load %arg4[%72, %c0_33, %c0_34] : memref<8x1x128xf32, #tpu.memory_space<vmem>>, vector<1x1x128xf32>
      %74 = vector.shape_cast %73 : vector<1x1x128xf32> to vector<1x128xf32>
      %75 = arith.mulf %71, %74 : vector<1x128xf32>
      %76 = arith.addf %arg7, %75 : vector<1x128xf32>
      scf.yield %76 : vector<1x128xf32>
    }
    %64 = tpu.concatenate %7, %15, %23, %31, %39, %47, %55, %63 in 0 : vector<1x128xf32>, vector<1x128xf32>, vector<1x128xf32>, vector<1x128xf32>, vector<1x128xf32>, vector<1x128xf32>, vector<1x128xf32>, vector<1x128xf32> -> vector<8x128xf32>
    %c0 = arith.constant 0 : index
    %c0_30 = arith.constant 0 : index
    %65 = vector.load %arg5[%c0, %c0_30] : memref<8x128xf32, #tpu.memory_space<vmem>>, vector<8x128xf32>
    tpu.vector_store %arg5[%c0, %c0_30], %64 {strides = array<i32>} : memref<8x128xf32, #tpu.memory_space<vmem>>, vector<8x128xf32>,
    return
  }
  func.func @transform_0(%arg0: i32, %arg1: memref<8x8xi32, #tpu.memory_space<smem>>, %arg2: memref<8xi32, #tpu.memory_space<smem>>) -> (i32, i32, i32) {
    %c0_i32 = arith.constant 0 : i32
    %c0_i32_0 = arith.constant 0 : i32
    %c0_i32_1 = arith.constant 0 : i32
    %c0_i32_2 = arith.constant 0 : i32
    return %c0_i32, %c0_i32_0, %c0_i32_1 : i32, i32, i32
  }
  func.func @transform_1(%arg0: i32, %arg1: memref<8x8xi32, #tpu.memory_space<smem>>, %arg2: memref<8xi32, #tpu.memory_space<smem>>) -> (i32, i32, i32) {
    %c0_i32 = arith.constant 0 : i32
    %c0_i32_0 = arith.constant 0 : i32
    %c0_i32_1 = arith.constant 0 : i32
    %c0_i32_2 = arith.constant 0 : i32
    return %c0_i32, %c0_i32_0, %c0_i32_1 : i32, i32, i32
  }
  func.func @transform_2(%arg0: i32, %arg1: memref<8x8xi32, #tpu.memory_space<smem>>, %arg2: memref<8xi32, #tpu.memory_space<smem>>) -> (i32, i32) {
    %c0_i32 = arith.constant 0 : i32
    %c0_i32_0 = arith.constant 0 : i32
    return %arg0, %c0_i32 : i32, i32
  }
}

</mosaic_0001>

<bundles_post_ra>
// kernel: tpu_custom_call.1
= control target key start
LH: loop header
LB: loop body
LE: loop exit
PB: predicated region body
PF: predicated region fallthrough
CT: control target
= control target key end

     0   :  { %s983_s0 = inlined_call_operand.hbm [shape: s32[8,8], index: 0, kind: input, shape index: {}]   ;;  %s984_s2 = inlined_call_operand.hbm [shape: f32[32,1,128], index: 2, kind: input, shape index: {}]   ;;  %s985_s3 = inlined_call_operand.vmem [shape: f32[8,1,128], index: 3, kind: input, shape index: {}]   ;;  %s986_s4 = inlined_call_operand.hbm [shape: f32[8,128], index: 4, kind: output, shape index: {}]   ;;  %s987_s1 = inlined_call_operand.vmem [shape: s32[8], index: 1, kind: input, shape index: {}]  }
   0x1   :  { %s607_s17 = scalar_lea.hbm %s983_s0, 128 }
   0x2   :  { %p608_p0 = scmp.ne.s32.totalorder %s983_s0, %s607_s17  ;;  %p611_p1 = scmp.lt.u32.totalorder %s607_s17, %s983_s0 }
   0x4   :  { %p613_p2 = pnand %p611_p1, %p608_p0 }
   0x6   :  { %616 = shalt.err (!%p613_p2)  }
   0x7   :  { %s871_s22 = smov [#allocation3]   ;;  %s11_s27 = sshll.u32 %s987_s1, 4  ;;  %s12_s27 = int_to_ptr.vmem [resolvable:$true] %s11_s27 }
   0x8   :  { %10 = dma.hbm_to_smem %s983_s0, 128, %s871_s22, [#allocation2] }
   0x9   :  { %s617_s28 = scalar_lea.vmem %s12_s27, 16  ;;  %p622_p4 = scmp.lt.s32.totalorder %s12_s27, %s12_s27 }
   0xa   :  { %p618_p3 = scmp.ne.s32.totalorder %s12_s27, %s617_s28  ;;  %p623_p5 = scmp.lt.s32.totalorder %s617_s28, %s617_s28 }
   0xc   :  { %p624_p6 = por %p623_p5, %p622_p4 }
   0xe   :  { %p625_p7 = pnand %p624_p6, %p618_p3 }
  0x10   :  { %628 = shalt.err (!%p625_p7)  }
  0x11   :  { %s872_s29 = smov [#allocation4]  }
  0x12   :  { %14 = dma.vmem_to_smem %s12_s27, 16, %s872_s29, [#allocation2] }
  0x13   :  { %769 = dma.done.wait [#allocation2], 144 }
  0x14   :  { %770 = vsyncadd [#allocation2], 4294967152 }
  0x15   :  { %16 = sfence }
  0x16   :  { %17 = vsyncpa [#allocation6], 0 }
  0x17   :  { %18 = vsyncpa [#allocation7], 0  ;;  %s873_s0 = smov [#allocation5]   ;;  %s629_s6 = scalar_lea.hbm %s984_s2, 512 }
  0x18   :  { %s24_s30 = sshll.u32 %s873_s0, 4  ;;  %p630_p8 = scmp.ne.s32.totalorder %s984_s2, %s629_s6  ;;  %s25_s30 = int_to_ptr.vmem [resolvable:$true] %s24_s30 }
  0x19   :  { %p633_p9 = scmp.lt.u32.totalorder %s629_s6, %s984_s2 }
  0x1b   :  { %p635_p10 = pnand %p633_p9, %p630_p8 }
  0x1d   :  { %638 = shalt.err (!%p635_p10)
}
  0x1e   :  { %s639_s11 = scalar_lea.vmem %s25_s30, 512  ;;  %p644_p12 = scmp.lt.s32.totalorder %s25_s30, %s25_s30 }
  0x1f   :  { %p640_p11 = scmp.ne.s32.totalorder %s25_s30, %s639_s11  ;;  %p645_p13 = scmp.lt.s32.totalorder %s639_s11, %s639_s11 }
  0x21   :  { %p646_p0 = por %p645_p13, %p644_p12 }
  0x23   :  { %p647_p1 = pnand %p646_p0, %p640_p11 }
  0x25   :  { %650 = shalt.err (!%p647_p1)
}
  0x26   :  { %s874_s12 = smov 16   ;;  %s875_s13 = smov 1  }
  0x27   :  { %30 = dma.hbm_to_vmem [thread:$0]  %s984_s2, 512, %s25_s30, [#allocation6], %s874_s12, %s874_s12, %s875_s13  }
  0x28   :  { %771 = dma.done.wait [#allocation6], 512  }
  0x29   :  { %772 = vsyncadd [#allocation6], 4294966784  ;;  %s37_s16 = sld [smem:[#allocation4]]  ;;  %v783_v0 = vmov 0.0  }
  0x2f   :  { %p372_p2 = scmp.le.s32.totalorder %s37_s16, 0 }
  0x30   :  { %v775_v1 = vmov (!%p372_p2), 0.0   ;;  %s779_s17 = smov (!%p372_p2), 0  }
  0x31   :  { %311 = sbr.rel (%p372_p2) target bundleno = 72 (0x48), region = 98 }
  0x38 LB: > { %s45_s18 = sshra.s32 %s781_s17, 7  ;;  %s50_s19 = sand.u32 127, %s781_s17  ;;  %s781_s17 = sphi %s779_s17, %s41_s17   ;;  %v777_v1 = vphi %v775_v1, %v776_v1  }
  0x39   : > { %s373_s20 = sshll.u32 %s45_s18, 7  ;;  %s55_s2 = scalar_lea.vmem %s985_s3, %s781_s17 }
  0x3a   : > { %s51_s21 = sadd.s32 %s373_s20, %s50_s19  ;;  %v56_v2 = vld [vmem:[%s55_s2] sm:$0x1]  ;;  %s41_s17 = sadd.s32 1, %s781_s17  }
  0x3b   : > { %s52_s22 = sld [smem:[#allocation3 + %s51_s21]]  ;;  %p40_p3 = scmp.ge.s32.totalorder %s41_s17, %s37_s16 }
  0x41   : > { %s53_s25 = scalar_lea.vmem [#allocation5], %s52_s22  ;;  %43 = sbr.rel (!%p40_p3) target bundleno = 56 (0x38), region = 104 }
  0x42   : > { %v54_v3 = vld [vmem:[%s53_s25] sm:$0x1] }
  0x43   : > { %v57_v4 = vmul.f32 %v56_v2, %v54_v3 }
  0x45   : > { %v58_v5 = vadd.f32 %v777_v1, %v57_v4  }
  0x47   : > { %v776_v1 = vmov %v58_v5   ;;  %v784_v0 = vmov (%p40_p3), %v58_v5  }
  0x48 PF:  { %s374_s26 = sld [smem:[#allocation4 + $0x1]]  ;;  %v795_v6 = vmov 0.0   ;;  %v785_v0 = vphi %v783_v0, %v784_v0  }
  0x4e   :  { %p375_p4 = scmp.le.s32.totalorder %s374_s26, 0 }
  0x4f   :  { %v787_v7 = vmov (!%p375_p4), 0.0   ;;  %s791_s27 = smov (!%p375_p4), 0  }
  0x50   :  { %319 = sbr.rel (%p375_p4) target bundleno = 104 (0x68), region = 109 }
  0x57 LB: > { %s68_s28 = sshra.s32 %s793_s27, 7  ;;  %s73_s29 = sand.u32 127, %s793_s27  ;;  %s793_s27 = sphi %s791_s27, %s64_s27   ;;  %v789_v7 = vphi %v787_v7, %v788_v7  }
  0x58   : > { %s395_s0 = sshll.u32 %s68_s28, 7  ;;  %s78_s8 = scalar_lea.vmem %s985_s3, %s793_s27 }
  0x59   : > { %s396_s30 = sadd.s32 128, %s395_s0  ;;  %v79_v8 = vld [vmem:[%s78_s8] sm:$0x1]  ;;  %s64_s27 = sadd.s32 1, %s793_s27  }
  0x5a   : > { %s74_s5 = sadd.s32 %s396_s30, %s73_s29  ;;  %p63_p5 = scmp.ge.s32.totalorder %s64_s27, %s374_s26 }
  0x5b   : > { %s75_s1 = sld [smem:[#allocation3 + %s74_s5]] }
  0x61   : > { %s76_s9 = scalar_lea.vmem [#allocation5], %s75_s1  ;;  %66 = sbr.rel (!%p63_p5) target bundleno = 87 (0x57), region = 115 }
  0x62   : > { %v77_v9 = vld [vmem:[%s76_s9] sm:$0x1] }
  0x63   : > { %v80_v10 = vmul.f32 %v79_v8, %v77_v9 }
  0x65   : > { %v81_v11 = vadd.f32 %v789_v7, %v80_v10  }
  0x67   : > { %v788_v7 = vmov %v81_v11   ;;  %v796_v6 = vmov (%p63_p5), %v81_v11  }
  0x68 PF:  { %s377_s10 = sld [smem:[#allocation4 + $0x2]]  ;;  %v807_v12 = vmov 0.0   ;;  %v797_v6 = vphi %v795_v6, %v796_v6  }
  0x6e   :  { %p378_p6 = scmp.le.s32.totalorder %s377_s10, 0 }
  0x6f   :  { %v799_v13 = vmov (!%p378_p6), 0.0   ;;  %s803_s11 = smov (!%p378_p6), 0  }
  0x70   :  { %327 = sbr.rel (%p378_p6) target bundleno = 136 (0x88), region = 120 }
  0x77 LB: > { %s91_s12 = sshra.s32 %s805_s11, 7  ;;  %s96_s13 = sand.u32 127, %s805_s11  ;;  %s805_s11 = sphi %s803_s11, %s87_s11   ;;  %v801_v13 = vphi %v799_v13, %v800_v13  }
  0x78   : > { %s397_s14 = sshll.u32 %s91_s12, 7  ;;  %s101_s20 = scalar_lea.vmem %s985_s3, %s805_s11 }
  0x79   : > { %s398_s15 = sadd.s32 256, %s397_s14  ;;  %v102_v14 = vld [vmem:[%s101_s20] sm:$0x1]  ;;  %s87_s11 = sadd.s32 1, %s805_s11  }
  0x7a   : > { %s97_s16 = sadd.s32 %s398_s15, %s96_s13  ;;  %p86_p7 = scmp.ge.s32.totalorder %s87_s11, %s377_s10 }
  0x7b   : > { %s98_s17 = sld [smem:[#allocation3 + %s97_s16]] }
  0x81   : > { %s99_s21 = scalar_lea.vmem [#allocation5], %s98_s17  ;;  %89 = sbr.rel (!%p86_p7) target bundleno = 119 (0x77), region = 126 }
  0x82   : > { %v100_v15 = vld [vmem:[%s99_s21] sm:$0x1] }
  0x83   : > { %v103_v16 = vmul.f32 %v102_v14, %v100_v15 }
  0x85   : > { %v104_v17 = vadd.f32 %v801_v13, %v103_v16  }
  0x87   : > { %v800_v13 = vmov %v104_v17   ;;  %v808_v12 = vmov (%p86_p7), %v104_v17  }
  0x88 PF:  { %s380_s22 = sld [smem:[#allocation4 + $0x3]]  ;;  %v819_v18 = vmov 0.0   ;;  %v809_v12 = vphi %v807_v12, %v808_v12  }
  0x8e   :  { %p381_p8 = scmp.le.s32.totalorder %s380_s22, 0 }
  0x8f   :  { %v811_v19 = vmov (!%p381_p8), 0.0   ;;  %s815_s23 = smov (!%p381_p8), 0  }
  0x90   :  { %335 = sbr.rel (%p381_p8) target bundleno = 168 (0xa8), region = 131 }
  0x97 LB: > { %s114_s24 = sshra.s32 %s817_s23, 7  ;;  %s119_s2 = sand.u32 127, %s817_s23  ;;  %s817_s23 = sphi %s815_s23, %s110_s23   ;;  %v813_v19 = vphi %v811_v19, %v812_v19  }
  0x98   : > { %s399_s25 = sshll.u32 %s114_s24, 7  ;;  %s124_s30 = scalar_lea.vmem %s985_s3, %s817_s23 }
  0x99   : > { %s400_s26 = sadd.s32 384, %s399_s25  ;;  %v125_v20 = vld [vmem:[%s124_s30] sm:$0x1]  ;;  %s110_s23 = sadd.s32 1, %s817_s23  }
  0x9a   : > { %s120_s27 = sadd.s32 %s400_s26, %s119_s2  ;;  %p109_p9 = scmp.ge.s32.totalorder %s110_s23, %s380_s22 }
  0x9b   : > { %s121_s28 = sld [smem:[#allocation3 + %s120_s27]] }
  0xa1   : > { %s122_s5 = scalar_lea.vmem [#allocation5], %s121_s28  ;;  %112 = sbr.rel (!%p109_p9) target bundleno = 151 (0x97), region = 137 }
  0xa2   : > { %v123_v21 = vld [vmem:[%s122_s5] sm:$0x1] }
  0xa3   : > { %v126_v22 = vmul.f32 %v125_v20, %v123_v21 }
  0xa5   : > { %v127_v23 = vadd.f32 %v813_v19, %v126_v22  }
  0xa7   : > { %v812_v19 = vmov %v127_v23   ;;  %v820_v18 = vmov (%p109_p9), %v127_v23  }
  0xa8 PF:  { %s383_s1 = sld [smem:[#allocation4 + $0x4]]  ;;  %v831_v24 = vmov 0.0   ;;  %v821_v18 = vphi %v819_v18, %v820_v18  }
  0xae   :  { %p384_p10 = scmp.le.s32.totalorder %s383_s1, 0 }
  0xaf   :  { %v823_v25 = vmov (!%p384_p10), 0.0   ;;  %s827_s6 = smov (!%p384_p10), 0  }
  0xb0   :  { %343 = sbr.rel (%p384_p10) target bundleno = 200 (0xc8), region = 142 }
  0xb7 LB: > { %s137_s7 = sshra.s32 %s829_s6, 7  ;;  %s142_s8 = sand.u32 127, %s829_s6  ;;  %s829_s6 = sphi %s827_s6, %s133_s6   ;;  %v825_v25 = vphi %v823_v25, %v824_v25  }
  0xb8   : > { %s401_s9 = sshll.u32 %s137_s7, 7  ;;  %s147_s15 = scalar_lea.vmem %s985_s3, %s829_s6 }
  0xb9   : > { %s402_s10 = sadd.s32 512, %s401_s9  ;;  %v148_v26 = vld [vmem:[%s147_s15] sm:$0x1]  ;;  %s133_s6 = sadd.s32 1, %s829_s6  }
  0xba   : > { %s143_s11 = sadd.s32 %s402_s10, %s142_s8  ;;  %p132_p11 = scmp.ge.s32.totalorder %s133_s6, %s383_s1 }
  0xbb   : > { %s144_s12 = sld [smem:[#allocation3 + %s143_s11]] }
  0xc1   : > { %s145_s16 = scalar_lea.vmem [#allocation5], %s144_s12  ;;  %135 = sbr.rel (!%p132_p11) target bundleno = 183 (0xb7), region = 148 }
  0xc2   : > { %v146_v27 = vld [vmem:[%s145_s16] sm:$0x1] }
  0xc3   : > { %v149_v28 = vmul.f32 %v148_v26, %v146_v27 }
  0xc5   : > { %v150_v29 = vadd.f32 %v825_v25, %v149_v28  }
  0xc7   : > { %v824_v25 = vmov %v150_v29   ;;  %v832_v24 = vmov (%p132_p11), %v150_v29  }
  0xc8 PF:  { %s386_s17 = sld [smem:[#allocation4 + $0x5]]  ;;  %v843_v30 = vmov 0.0   ;;  %v833_v24 = vphi %v831_v24, %v832_v24  }
  0xce   :  { %p387_p12 = scmp.le.s32.totalorder %s386_s17, 0 }
  0xcf   :  { %v835_v31 = vmov (!%p387_p12), 0.0   ;;  %s839_s18 = smov (!%p387_p12), 0  }
  0xd0   :  { %351 = sbr.rel (%p387_p12) target bundleno = 232 (0xe8), region = 153 }
  0xd7 LB: > { %s160_s19 = sshra.s32 %s841_s18, 7  ;;  %s165_s20 = sand.u32 127, %s841_s18  ;;  %s841_s18 = sphi %s839_s18, %s156_s18   ;;  %v837_v31 = vphi %v835_v31, %v836_v31  }
  0xd8   : > { %s403_s21 = sshll.u32 %s160_s19, 7  ;;  %s170_s26 = scalar_lea.vmem %s985_s3, %s841_s18 }
  0xd9   : > { %s404_s22 = sadd.s32 640, %s403_s21  ;;  %v171_v32 = vld [vmem:[%s170_s26] sm:$0x1]  ;;  %s156_s18 = sadd.s32 1, %s841_s18  }
  0xda   : > { %s166_s23 = sadd.s32 %s404_s22, %s165_s20  ;;  %p155_p13 = scmp.ge.s32.totalorder %s156_s18, %s386_s17 }
  0xdb   : > { %s167_s24 = sld [smem:[#allocation3 + %s166_s23]] }
  0xe1   : > { %s168_s27 = scalar_lea.vmem [#allocation5], %s167_s24  ;;  %158 = sbr.rel (!%p155_p13) target bundleno = 215 (0xd7), region = 159 }
  0xe2   : > { %v169_v33 = vld [vmem:[%s168_s27] sm:$0x1] }
  0xe3   : > { %v172_v34 = vmul.f32 %v171_v32, %v169_v33 }
  0xe5   : > { %v173_v35 = vadd.f32 %v837_v31, %v172_v34  }
  0xe7   : > { %v836_v31 = vmov %v173_v35   ;;  %v844_v30 = vmov (%p155_p13), %v173_v35  }
  0xe8 PF:  { %s389_s28 = sld [smem:[#allocation4 + $0x6]]  ;;  %v855_v36 = vmov 0.0   ;;  %v845_v30 = vphi %v843_v30, %v844_v30  }
  0xee   :  { %p390_p0 = scmp.le.s32.totalorder %s389_s28, 0 }
  0xef   :  { %v847_v37 = vmov (!%p390_p0), 0.0   ;;  %s851_s29 = smov (!%p390_p0), 0  }
  0xf0   :  { %359 = sbr.rel (%p390_p0) target bundleno = 264 (0x108), region = 164 }
  0xf7 LB: > { %s183_s0 = sshra.s32 %s853_s29, 7  ;;  %s188_s30 = sand.u32 127, %s853_s29  ;;  %s853_s29 = sphi %s851_s29, %s179_s29   ;;  %v849_v37 = vphi %v847_v37, %v848_v37  }
  0xf8   : > { %s405_s5 = sshll.u32 %s183_s0, 7  ;;  %s193_s10 = scalar_lea.vmem %s985_s3, %s853_s29 }
  0xf9   : > { %s406_s1 = sadd.s32 768, %s405_s5  ;;  %v194_v38 = vld [vmem:[%s193_s10] sm:$0x1]  ;;  %s179_s29 = sadd.s32 1, %s853_s29  }
  0xfa   : > { %s189_s6 = sadd.s32 %s406_s1, %s188_s30  ;;  %p178_p1 = scmp.ge.s32.totalorder %s179_s29, %s389_s28 }
  0xfb   : > { %s190_s7 = sld [smem:[#allocation3 + %s189_s6]] }
 0x101   : > { %s191_s11 = scalar_lea.vmem [#allocation5], %s190_s7  ;;  %181 = sbr.rel (!%p178_p1) target bundleno = 247 (0xf7), region = 170 }
 0x102   : > { %v192_v39 = vld [vmem:[%s191_s11] sm:$0x1] }
 0x103   : > { %v195_v40 = vmul.f32 %v194_v38, %v192_v39 }
 0x105   : > { %v196_v41 = vadd.f32 %v849_v37, %v195_v40  }
 0x107   : > { %v848_v37 = vmov %v196_v41   ;;  %v856_v36 = vmov (%p178_p1), %v196_v41  }
 0x108 PF:  { %s392_s12 = sld [smem:[#allocation4 + $0x7]]  ;;  %v867_v42 = vmov 0.0   ;;  %v857_v36 = vphi %v855_v36, %v856_v36  }
 0x10e   :  { %p393_p2 = scmp.le.s32.totalorder %s392_s12, 0 }
 0x10f   :  { %v859_v43 = vmov (!%p393_p2), 0.0   ;;  %s863_s13 = smov (!%p393_p2), 0  }
 0x110   :  { %367 = sbr.rel (%p393_p2) target bundleno = 296 (0x128), region = 175 }
 0x117 LB: > { %s206_s14 = sshra.s32 %s865_s13, 7  ;;  %s211_s15 = sand.u32 127, %s865_s13  ;;  %s865_s13 = sphi %s863_s13, %s202_s13   ;;  %v861_v43 = vphi %v859_v43, %v860_v43  }
 0x118   : > { %s407_s16 = sshll.u32 %s206_s14, 7  ;;  %s216_s22 = scalar_lea.vmem %s985_s3, %s865_s13 }
 0x119   : > { %s408_s17 = sadd.s32 896, %s407_s16  ;;  %v217_v44 = vld [vmem:[%s216_s22] sm:$0x1]  ;;  %s202_s13 = sadd.s32 1, %s865_s13  }
 0x11a   : > { %s212_s18 = sadd.s32 %s408_s17, %s211_s15  ;;  %p201_p3 = scmp.ge.s32.totalorder %s202_s13, %s392_s12 }
 0x11b   : > { %s213_s19 = sld [smem:[#allocation3 + %s212_s18]] }
 0x121   : > { %s214_s23 = scalar_lea.vmem [#allocation5], %s213_s19  ;;  %204 = sbr.rel (!%p201_p3) target bundleno = 279 (0x117), region = 181 }
 0x122   : > { %v215_v45 = vld [vmem:[%s214_s23] sm:$0x1] }
 0x123   : > { %v218_v46 = vmul.f32 %v217_v44, %v215_v45 }
 0x125   : > { %v219_v47 = vadd.f32 %v861_v43, %v218_v46  }
 0x127   : > { %v860_v43 = vmov %v219_v47   ;;  %v868_v42 = vmov (%p201_p3), %v219_v47  }
 0x128 PF:  { %v221_v48 = vlaneseq  ;;  %vm262_vm0 = vcmask 1040384   ;;  %vm264_vm1 = vcmask 1041408   ;;  %vm266_vm2 = vcmask 1042432   ;;  %s876_s3 = smov [#allocation8]   ;;  %v869_v42 = vphi %v867_v42, %v868_v42  }
 0x129   :  { %vm268_vm3 = vcmask 1043456   ;;  %vm270_vm4 = vcmask 1044480   ;;  %vm272_vm5 = vcmask 1045504   ;;  %s283_s24 = sshll.u32 %s876_s3, 4  ;;  %vm274_vm6 = vcmask 1046528   ;;  %s284_s24 = int_to_ptr.vmem [resolvable:$true] %s283_s24 }
 0x12a   :  { %v222_v49 = vshrl.u32 %v221_v48, 7  ;;  %s651_s2 = scalar_lea.vmem %s284_s24, 128  ;;  %p656_p5 = scmp.lt.s32.totalorder %s284_s24, %s284_s24 }
 0x12b   :  { %p652_p4 = scmp.ne.s32.totalorder %s284_s24, %s651_s2  ;;  %p657_p6 = scmp.lt.s32.totalorder %s651_s2, %s651_s2 }
 0x12c   :  { %v223_v50 = vsub.s32 0, %v222_v49 }
 0x12d   :  { %p658_p7 = por %p657_p6, %p656_p5 }
 0x12e   :  { %v224_v51 = vrot.slane %v797_v6, %v223_v50  ;;  %v230_v52 = vrot.slane %v809_v12, %v223_v50  ;;  %v236_v53 = vrot.slane %v821_v18, %v223_v50  ;;  %v242_v54 = vrot.slane %v833_v24, %v223_v50 }
 0x12f   :  { %v248_v55 = vrot.slane %v845_v30, %v223_v50  ;;  %v254_v57 = vrot.slane %v857_v36, %v223_v50  ;;  %v260_v59 = vrot.slane %v869_v42, %v223_v50  ;;  %p659_p8 = pnand %p658_p7, %p652_p4 }
 0x130   :  { %v263_v56 = vsel %vm262_vm0, %v785_v0, %v224_v51 }
 0x131   :  { %v265_v58 = vsel %vm264_vm1, %v263_v56, %v230_v52 }
 0x132   :  { %v267_v60 = vsel %vm266_vm2, %v265_v58, %v236_v53 }
 0x133   :  { %v269_v61 = vsel %vm268_vm3, %v267_v60, %v242_v54 }
 0x134   :  { %v271_v62 = vsel %vm270_vm4, %v269_v61, %v248_v55 }
 0x135   :  { %v273_v63 = vsel %vm272_vm5, %v271_v62, %v254_v57 }
 0x136   :  { %v275_v1 = vsel %vm274_vm6, %v273_v63, %v260_v59 }
 0x137   :  { %276 = vst [vmem:[#allocation8] sm:$0xff] %v275_v1 }
 0x138   :  { %662 = shalt.err (!%p659_p8)
}
 0x139   :  { %s663_s27 = scalar_lea.hbm %s986_s4, 128 }
 0x13a   :  { %p664_p9 = scmp.ne.s32.totalorder %s986_s4, %s663_s27  ;;  %p667_p10 = scmp.lt.u32.totalorder %s663_s27, %s986_s4 }
 0x13c   :  { %p669_p11 = pnand %p667_p10, %p664_p9 }
 0x13e   :  { %672 = shalt.err (!%p669_p11)
}
 0x13f   :  { %286 = dma.vmem_to_hbm [thread:$0]  %s284_s24, 128, %s986_s4, [#allocation7]  }
 0x140   :  { %773 = dma.done.wait [#allocation7], 128  }
 0x141   :  { %774 = vsyncadd [#allocation7], 4294967168 }
 0x142   :  { %290 = vsyncpa [#allocation6], 1 }
 0x143   :  { %291 = vsyncpa [#allocation7], 1 }

</bundles_post_ra>
